<compile_context>
chip_gen: v6e
topology: v6e:2x2x1
jax: 0.10.0
libtpu: 0.0.40
codegen_flags: <defaults>
</compile_context>

<pallas_src>
import jax
import jax.numpy as jnp
from jax import lax
from jax.experimental import pallas as pl
from jax.experimental.pallas import tpu as pltpu

_LANE = 128
_SUBLANE = 8
_SINGLE_PASS_MAX_M = 1024      # full-M resident f32 accumulator up to 4 MiB


def _round_up(x, n):
    return ((x + n - 1) // n) * n


def _vmem_plan():
    """(tk planning budget, vmem_limit ceiling) — generation aware."""
    cap = None
    try:
        cap = int(getattr(pltpu.get_tpu_info(), "vmem_capacity_bytes", 0)) or None
    except Exception:
        cap = None
    if cap is not None and cap >= (96 << 20):     # v5e / v6e: 128 MiB physical VMEM
        return 48 << 20, 100 << 20
    # v7x (64 MiB per TC) or unknown: stay conservative.
    return 20 << 20, 48 << 20


def _plan_k(k, tk_cap):
    """Pick (tk, k_pad): multiples of 128, tk <= tk_cap, k_pad kept minimal."""
    k128 = _round_up(k, _LANE)
    tk_cap = max(_LANE, (int(tk_cap) // _LANE) * _LANE)
    if k128 <= tk_cap:
        return k128, k128
    n_steps = -(-k128 // tk_cap)                        # ceil
    tk = _round_up(-(-k128 // n_steps), _LANE)          # balanced -> k_pad ~= k128
    return tk, n_steps * tk


def _pad_feats(feats, m, k, m_pad, k_pad):
    if (m_pad, k_pad) == (m, k):
        return feats                                    # no HBM pad copy at all
    return jnp.pad(feats, ((0, m_pad - m), (0, k_pad - k)))


def _gram_square_kernel(inv_total):
    """grid=(k_blocks,): full-M Gram accumulated directly into the output block."""
    def kernel(feat_ref, gram_ref):
        kk = pl.program_id(0)

        @pl.when(kk == 0)
        def _init():
            gram_ref[...] = jnp.zeros_like(gram_ref)

        f = feat_ref[...]                               # (m_pad, tk)
        gram_ref[...] += lax.dot_general(               # F . F^T, no transpose copy
            f, f, dimension_numbers=(((1,), (1,)), ((), ())),
            preferred_element_type=jnp.float32)

        @pl.when(kk == pl.num_programs(0) - 1)
        def _finalize():
            gram_ref[...] = gram_ref[...] * inv_total
    return kernel


def _gram_blocked_kernel(inv_total):
    """grid=(m_blocks, k_blocks): row block x full-M cols, rows via own BlockSpec."""
    def kernel(rows_ref, cols_ref, gram_ref):
        kk = pl.program_id(1)

        @pl.when(kk == 0)
        def _init():
            gram_ref[...] = jnp.zeros_like(gram_ref)

        gram_ref[...] += lax.dot_general(
            rows_ref[...], cols_ref[...],
            dimension_numbers=(((1,), (1,)), ((), ())),
            preferred_element_type=jnp.float32)

        @pl.when(kk == pl.num_programs(1) - 1)
        def _finalize():
            gram_ref[...] = gram_ref[...] * inv_total
    return kernel


def gram_matrix(x_nchw, *, tile_k=None, compute_dtype=None):
    """(F @ F.T) / (N*C*H*W) for F = x.reshape(N*C, H*W), via Pallas."""
    n, c, h, w = x_nchw.shape
    m, k = n * c, h * w
    feats = x_nchw.reshape(m, k)                        # contiguous reshape, no copy
    if compute_dtype is not None:
        feats = feats.astype(compute_dtype)
    itemsize = jnp.dtype(feats.dtype).itemsize
    inv_total = 1.0 / float(m * k)
    budget, limit_cap = _vmem_plan()

    if m <= _SINGLE_PASS_MAX_M:
        # ---- single-pass: one resident (m_pad, m_pad) output accumulator ----
        m_pad = _round_up(m, _SUBLANE)                  # sublane pad only (often none)
        resident = 2 * m_pad * m_pad * 4                # output block (counted x2)
        tk_cap = max(_LANE, max(budget - resident, 0) // (2 * m_pad * itemsize))
        if tile_k is not None:
            tk_cap = max(_LANE, _round_up(int(tile_k), _LANE))
        tk, k_pad = _plan_k(k, tk_cap)
        feats = _pad_feats(feats, m, k, m_pad, k_pad)
        k_blocks = k_pad // tk
        est = resident + 2 * m_pad * tk * itemsize + (2 << 20)
        vmem_limit = int(min(limit_cap, max(32 << 20, est)))

        gram_pad = pl.pallas_call(
            _gram_square_kernel(inv_total),
            out_shape=jax.ShapeDtypeStruct((m_pad, m_pad), jnp.float32),
            grid_spec=pltpu.PrefetchScalarGridSpec(
                num_scalar_prefetch=0,
                grid=(k_blocks,),
                in_specs=[pl.BlockSpec((m_pad, tk), lambda kk: (0, kk))],
                out_specs=pl.BlockSpec((m_pad, m_pad), lambda kk: (0, 0)),
            ),
            compiler_params=pltpu.CompilerParams(
                dimension_semantics=("arbitrary",),
                vmem_limit_bytes=vmem_limit,
            ),
        )(feats)
    else:
        # ---- blocked fallback for large M: rows through their own BlockSpec ----
        # TODO(synk): exploit Gram symmetry (row_block >= col_block) for very large M.
        m_pad = _round_up(m, _LANE)
        tm = 256 if m_pad % 256 == 0 else _LANE
        resident = 2 * tm * m_pad * 4                   # resident output row block
        per_k = 2 * (m_pad + tm) * itemsize             # cols slab + rows block (x2 bufs)
        tk_cap = max(_LANE, max(budget - resident, 0) // per_k)
        if tile_k is not None:
            tk_cap = max(_LANE, _round_up(int(tile_k), _LANE))
        tk, k_pad = _plan_k(k, tk_cap)
        feats = _pad_feats(feats, m, k, m_pad, k_pad)
        m_blocks, k_blocks = m_pad // tm, k_pad // tk
        est = resident + per_k * tk + (2 << 20)
        vmem_limit = int(min(limit_cap, max(32 << 20, est)))

        gram_pad = pl.pallas_call(
            _gram_blocked_kernel(inv_total),
            out_shape=jax.ShapeDtypeStruct((m_pad, m_pad), jnp.float32),
            grid_spec=pltpu.PrefetchScalarGridSpec(
                num_scalar_prefetch=0,
                grid=(m_blocks, k_blocks),
                in_specs=[
                    pl.BlockSpec((tm, tk), lambda i, kk: (i, kk)),      # rows
                    pl.BlockSpec((m_pad, tk), lambda i, kk: (0, kk)),   # all cols
                ],
                out_specs=pl.BlockSpec((tm, m_pad), lambda i, kk: (i, 0)),
            ),
            compiler_params=pltpu.CompilerParams(
                dimension_semantics=("parallel", "arbitrary"),
                vmem_limit_bytes=vmem_limit,
            ),
        )(feats, feats)

    if m_pad != m:
        gram_pad = gram_pad[:m, :m]
    return gram_pad


def style_loss_forward(x_nchw, target_gram, *, tile_k=None, compute_dtype=None,
                       return_gram=True):
    """StyleLoss.forward: returns (input pass-through, mse loss[, gram])."""
    gram = gram_matrix(x_nchw, tile_k=tile_k, compute_dtype=compute_dtype)
    # MSE over M^2 elements in the wrapper: negligible next to the M*K feature stream.
    loss = jnp.mean(jnp.square(gram - target_gram.astype(jnp.float32)))
    # TODO(synk): forward only; no custom_vjp for gradient-based NST optimization.
    if return_gram:
        return x_nchw, loss, gram
    return x_nchw, loss


# ------------------------------ reference & checks ------------------------------

def _gram_ref(x):
    n, c, h, w = x.shape
    f = x.reshape(n * c, h * w).astype(jnp.float32)
    g = jnp.dot(f, f.T, precision=lax.Precision.HIGHEST)
    return g / float(n * c * h * w)


def _check(x, target_feature, *, tile_k=None, rtol=1e-5, atol=1e-6):
    target_gram = gram_matrix(target_feature, tile_k=tile_k)
    out, loss, gram = style_loss_forward(x, target_gram, tile_k=tile_k)
    out, loss, gram, target_gram = jax.block_until_ready(
        (out, loss, gram, target_gram))

    ref_t = _gram_ref(target_feature)
    ref_g = _gram_ref(x)
    ref_loss = jnp.mean((ref_g - ref_t) ** 2)

    assert out.shape == x.shape and bool(jnp.array_equal(out, x)), "pass-through mismatch"
    assert jnp.allclose(target_gram, ref_t, rtol=rtol, atol=atol), "target gram mismatch"
    assert jnp.allclose(gram, ref_g, rtol=rtol, atol=atol), "gram mismatch"
    assert jnp.allclose(loss, ref_loss, rtol=rtol, atol=atol), (
        f"loss mismatch: {loss} vs {ref_loss}")


if __name__ == "__main__":
    key = jax.random.PRNGKey(0)
    keys = jax.random.split(key, 8)

    # Small NCHW conv feature map (module-spec shape): M=8, K=256, single-pass.
    N, C, H, W = 2, 4, 16, 16
    _check(jax.random.normal(keys[0], (N, C, H, W), dtype=jnp.float32),
           jax.random.normal(keys[1], (N, C, H, W), dtype=jnp.float32))

    # VGG-style layer: M=512 single-pass path, multiple K accumulation steps.
    _check(jax.random.normal(keys[2], (1, 512, 16, 16), dtype=jnp.float32),
           jax.random.normal(keys[3], (1, 512, 16, 16), dtype=jnp.float32),
           tile_k=128)

    # K not a multiple of 128 (H=W=14): exercises minimal K zero-padding.
    _check(jax.random.normal(keys[4], (1, 32, 14, 14), dtype=jnp.float32),
           jax.random.normal(keys[5], (1, 32, 14, 14), dtype=jnp.float32))

    # Large-M blocked fallback path (M = 1280 > 1024, parallel row blocks).
    _check(jax.random.normal(keys[6], (2, 640, 8, 8), dtype=jnp.float32),
           jax.random.normal(keys[7], (2, 640, 8, 8), dtype=jnp.float32))

    # Optional bf16 MXU operands (f32 accumulation kept) — loose tolerance.
    xb = jax.random.normal(keys[0], (1, 64, 16, 16), dtype=jnp.float32)
    g_bf16 = jax.block_until_ready(gram_matrix(xb, compute_dtype=jnp.bfloat16))
    assert jnp.allclose(g_bf16, _gram_ref(xb), rtol=5e-2, atol=5e-3), "bf16 gram mismatch"

    print("KERNEL_OK")
</pallas_src>

<mosaic_0001>
module attributes {stable_mosaic.version = 11 : i64} {
  func.func @kernel(%arg0: i32, %arg1: memref<8x256xf32, #tpu.memory_space<vmem>>, %arg2: memref<8x8xf32, #tpu.memory_space<vmem>>) attributes {dimension_semantics = [#tpu.dimension_semantics<arbitrary>], iteration_bounds = array<i64: 1>, scalar_prefetch = 0 : i64, scratch_operands = 0 : i64, tpu.core_type = #tpu.core_type<tc>, window_params = [{transform_indices = @transform_0, window_bounds = array<i64: 8, 256>}, {pipeline_mode = #tpu.pipeline_mode<synchronous>, transform_indices = @transform_1, window_bounds = array<i64: 8, 8>}]} {
    %c0_i32 = arith.constant 0 : i32
    %0 = arith.cmpi eq, %arg0, %c0_i32 : i32
    %1 = arith.extui %0 : i1 to i32
    %c0_i32_0 = arith.constant 0 : i32
    %2 = arith.cmpi ne, %1, %c0_i32_0 : i32
    scf.if %2 {
      %cst_8 = arith.constant 0.000000e+00 : f32
      %11 = vector.broadcast %cst_8 : f32 to vector<8x8xf32>
      %c0_9 = arith.constant 0 : index
      %c0_10 = arith.constant 0 : index
      %12 = vector.load %arg2[%c0_9, %c0_10] : memref<8x8xf32, #tpu.memory_space<vmem>>, vector<8x8xf32>
      tpu.vector_store %arg2[%c0_9, %c0_10], %11 {strides = array<i32>} : memref<8x8xf32, #tpu.memory_space<vmem>>, vector<8x8xf32>,
    } else {
    }
    %c0 = arith.constant 0 : index
    %c0_1 = arith.constant 0 : index
    %3 = vector.load %arg1[%c0, %c0_1] : memref<8x256xf32, #tpu.memory_space<vmem>>, vector<8x256xf32>
    %c0_2 = arith.constant 0 : index
    %c0_3 = arith.constant 0 : index
    %4 = vector.load %arg2[%c0_2, %c0_3] : memref<8x8xf32, #tpu.memory_space<vmem>>, vector<8x8xf32>
    %cst = arith.constant dense<0.000000e+00> : vector<8x8xf32>
    %5 = tpu.matmul %3, %3, %cst {dimension_numbers = #tpu.dot_dimension_numbers<[1], [1], [0], [0], [0, 0, 1, 0], [], []>} : vector<8x256xf32>, vector<8x256xf32>, vector<8x8xf32> -> vector<8x8xf32>
    %6 = arith.addf %4, %5 : vector<8x8xf32>
    %c0_4 = arith.constant 0 : index
    %c0_5 = arith.constant 0 : index
    %7 = vector.load %arg2[%c0_4, %c0_5] : memref<8x8xf32, #tpu.memory_space<vmem>>, vector<8x8xf32>
    tpu.vector_store %arg2[%c0_4, %c0_5], %6 {strides = array<i32>} : memref<8x8xf32, #tpu.memory_space<vmem>>, vector<8x8xf32>,
    %c0_i32_6 = arith.constant 0 : i32
    %8 = arith.cmpi eq, %arg0, %c0_i32_6 : i32
    %9 = arith.extui %8 : i1 to i32
    %c0_i32_7 = arith.constant 0 : i32
    %10 = arith.cmpi ne, %9, %c0_i32_7 : i32
    scf.if %10 {
      %c0_8 = arith.constant 0 : index
      %c0_9 = arith.constant 0 : index
      %11 = vector.load %arg2[%c0_8, %c0_9] : memref<8x8xf32, #tpu.memory_space<vmem>>, vector<8x8xf32>
      %cst_10 = arith.constant 4.8828125E-4 : f32
      %12 = vector.broadcast %cst_10 : f32 to vector<8x8xf32>
      %13 = arith.mulf %11, %12 : vector<8x8xf32>
      %c0_11 = arith.constant 0 : index
      %c0_12 = arith.constant 0 : index
      %14 = vector.load %arg2[%c0_11, %c0_12] : memref<8x8xf32, #tpu.memory_space<vmem>>, vector<8x8xf32>
      tpu.vector_store %arg2[%c0_11, %c0_12], %13 {strides = array<i32>} : memref<8x8xf32, #tpu.memory_space<vmem>>, vector<8x8xf32>,
    } else {
    }
    return
  }
  func.func @transform_0(%arg0: i32) -> (i32, i32) {
    %c0_i32 = arith.constant 0 : i32
    %c0_i32_0 = arith.constant 0 : i32
    return %c0_i32, %arg0 : i32, i32
  }
  func.func @transform_1(%arg0: i32) -> (i32, i32) {
    %c0_i32 = arith.constant 0 : i32
    %c0_i32_0 = arith.constant 0 : i32
    %c0_i32_1 = arith.constant 0 : i32
    return %c0_i32, %c0_i32_0 : i32, i32
  }
}

</mosaic_0001>

<bundles_post_ra>
// kernel: tpu_custom_call.1
= control target key start
LH: loop header
LB: loop body
LE: loop exit
PB: predicated region body
PF: predicated region fallthrough
CT: control target
= control target key end

     0   :  { %6 = vsyncpa [#allocation3], 0  ;;  %s193_s0 = inlined_call_operand.hbm [shape: f32[8,256], index: 0, kind: input, shape index: {}]   ;;  %s194_s1 = inlined_call_operand.hbm [shape: f32[8,8], index: 1, kind: output, shape index: {}]  }
   0x1   :  { %7 = vsyncpa [#allocation4], 0  ;;  %s171_s6 = smov [#allocation2]  }
   0x2   :  { %s14_s7 = sshll.u32 %s171_s6, 4  ;;  %s15_s7 = int_to_ptr.vmem [resolvable:$true] %s14_s7 }
   0x3   :  { %s135_s8 = scalar_lea.vmem %s15_s7, 256  ;;  %p140_p1 = scmp.lt.s32.totalorder %s15_s7, %s15_s7 }
   0x4   :  { %p136_p0 = scmp.ne.s32.totalorder %s15_s7, %s135_s8  ;;  %p141_p2 = scmp.lt.s32.totalorder %s135_s8, %s135_s8 }
   0x6   :  { %p142_p3 = por %p141_p2, %p140_p1 }
   0x8   :  { %p143_p4 = pnand %p142_p3, %p136_p0 }
   0xa   :  { %146 = shalt.err (!%p143_p4)
}
   0xb   :  { %17 = dma.hbm_to_vmem [thread:$0]  %s193_s0, 256, %s15_s7, [#allocation3]  }
   0xc   :  { %167 = dma.done.wait [#allocation3], 256  }
   0xd   :  { %168 = vsyncadd [#allocation3], 4294967040  ;;  %vm25_vm0 = vcmask 64512   ;;  %v172_v0 = vmov 0.0   ;;  %v28_v1 = vld [vmem:[#allocation2 + $0x8] sm:$0xff]  ;;  %v27_v2 = vld [vmem:[#allocation2] sm:$0xff] }
   0xe   :  { %26 = vst.msk [vmem:[#allocation5] sm:$0xff] %vm25_vm0, %v172_v0  ;;  %60 = vmatprep.subr.mxu0 %v28_v1  ;;  %94 = vmatprep.mubr.f32.mxu0 %v28_v1  ;;  %s173_s11 = smov [#allocation5]  }
   0xf   :  { %61 = vmatpush1.xpose.msra.mxu0 %v27_v2  ;;  %s115_s0 = sshll.u32 %s173_s11, 4  ;;  %s116_s0 = int_to_ptr.vmem [resolvable:$true] %s115_s0 }
  0x10   :  { %s147_s12 = scalar_lea.vmem %s116_s0, 128  ;;  %p152_p6 = scmp.lt.s32.totalorder %s116_s0, %s116_s0 }
  0x11   :  { %p148_p5 = scmp.ne.s32.totalorder %s116_s0, %s147_s12  ;;  %p153_p7 = scmp.lt.s32.totalorder %s147_s12, %s147_s12 }
  0x12   :  { %95 = vmatmul.mubr.f32.vlgmr.msra.gmra.mxu0 %v27_v2 }
  0x13   :  { %p154_p8 = por %p153_p7, %p152_p6 }
  0x15   :  { %v29_v3 = vld [vmem:[#allocation5] sm:$0xff]  ;;  %p155_p9 = pnand %p154_p8, %p148_p5 }
  0xd2   :  { %v96_v4 = vpop.f32.mrf.mxu0 }
  0xd3   :  { %v100_v5 = vadd.f32 %v96_v4, %v29_v3 }
  0xd4   :  { %v98_v6 = vpop.f32.mrf.mxu0 }
  0xd5   :  { %102 = vst.msk [vmem:[#allocation5] sm:$0xff] %vm25_vm0, %v100_v5 }
  0xdc   :  { %v106_v7 = vld [vmem:[#allocation5] sm:$0xff] }
  0xdd   :  { %v107_v8 = vmul.f32 0.00048828125, %v106_v7 }
  0xdf   :  { %108 = vst.msk [vmem:[#allocation5] sm:$0xff] %vm25_vm0, %v107_v8 }
  0xe0   :  { %158 = shalt.err (!%p155_p9)
}
  0xe1   :  { %118 = dma.vmem_to_hbm [thread:$0]  %s116_s0, 128, %s194_s1, [#allocation4]  }
  0xe2   :  { %169 = dma.done.wait [#allocation4], 128  }
  0xe3   :  { %170 = vsyncadd [#allocation4], 4294967168 }
  0xe4   :  { %122 = vsyncpa [#allocation3], 1 }
  0xe5   :  { %123 = vsyncpa [#allocation4], 1 }

</bundles_post_ra>
